<compile_context>
chip_gen: v7x
topology: tpu7x:2x2x1
jax: 0.10.0
libtpu: 0.0.40
codegen_flags: <defaults>
</compile_context>

<pallas_src>
import functools

import jax
import jax.numpy as jnp
from jax.experimental import pallas as pl
from jax.experimental.pallas import tpu as pltpu


def _cdiv(a, b):
    return -(-a // b)


def _smooth_l1_kernel(x_ref, t_ref, o_ref, acc_ref, *,
                      weight, B, D, TB, TD, grid_dc,
                      need_row_mask, need_col_mask):
    i = pl.program_id(0)   # batch-tile index            ("parallel")
    j = pl.program_id(1)   # core-split of feature range ("parallel")
    k = pl.program_id(2)   # feature-tile index           ("arbitrary", reduction)

    # Init the resident accumulator at the start of each reduction sweep.
    @pl.when(k == 0)
    def _():
        acc_ref[...] = jnp.zeros_like(acc_ref)

    # Elementwise Huber on the (TB, TD) tile — pure VPU, hidden under HBM bound.
    d = (x_ref[...].astype(jnp.float32) - t_ref[...].astype(jnp.float32)) * weight
    ad = jnp.abs(d)
    v = jnp.where(ad < 1.0, 0.5 * d * d, ad - 0.5)

    # Mask ragged tails (trace-time decision; zero cost when shapes divide evenly).
    if need_row_mask or need_col_mask:
        valid = None
        if need_row_mask:
            row = i * TB + jax.lax.broadcasted_iota(jnp.int32, (TB, TD), 0)
            valid = row < B
        if need_col_mask:
            col = (j * grid_dc + k) * TD + jax.lax.broadcasted_iota(
                jnp.int32, (TB, TD), 1)
            cmask = col < D
            valid = cmask if valid is None else (valid & cmask)
        v = jnp.where(valid, v, 0.0)

    # Plain VPU add into the vreg-shaped running sum; no per-tile XLU reduce.
    acc_ref[...] += v

    # Finalize: one cross-lane/cross-sublane reduce per output block, written
    # once into a lane-dense (8,128) tile (scalar at [0,0], zeros elsewhere).
    @pl.when(k == pl.num_programs(2) - 1)
    def _():
        s = jnp.sum(acc_ref[...])
        r = jax.lax.broadcasted_iota(jnp.int32, (8, 128), 0)
        c = jax.lax.broadcasted_iota(jnp.int32, (8, 128), 1)
        o_ref[...] = jnp.where((r == 0) & (c == 0), s, 0.0)


def smooth_l1_loss(inp, tgt, weight=1.0, *, tb_cap=256, td_cap=1024,
                   num_core_splits=2):
    """SmoothL1 (Huber) loss: mean over batch of per-row sums."""
    # TODO(synk): weight is baked as a compile-time scalar (matches the module's
    # Python hyperparameter); a traced/array weight would need an SMEM scalar.
    B = inp.shape[0]
    x = inp.reshape(B, -1)
    t = tgt.reshape(B, -1)
    D = x.shape[1]

    # Tile sizes: either the full dim (always legal) or a (8,128)-aligned cap.
    TB = B if B <= tb_cap else tb_cap          # tb_cap is a multiple of 8
    TD = D if D <= td_cap else td_cap          # td_cap is a multiple of 128
    grid_b = _cdiv(B, TB)
    grid_d = _cdiv(D, TD)

    # v7x: split the feature-reduction range across the two TensorCores when
    # there is more than one feature tile; on v5e/v6e it is just a serial loop.
    nc = num_core_splits if grid_d >= num_core_splits else 1
    grid_dc = _cdiv(grid_d, nc)

    need_row_mask = (B % TB) != 0
    need_col_mask = ((D % TD) != 0) or (nc * grid_dc != grid_d)

    def in_map(i, j, k):
        # Clamp so a fully out-of-range tile (ragged core split) re-reads the
        # last valid block; its contribution is masked to zero in the kernel.
        return (i, jnp.minimum(j * grid_dc + k, grid_d - 1))

    kernel = functools.partial(
        _smooth_l1_kernel,
        weight=float(weight), B=B, D=D, TB=TB, TD=TD, grid_dc=grid_dc,
        need_row_mask=need_row_mask, need_col_mask=need_col_mask)

    out = pl.pallas_call(
        kernel,
        out_shape=jax.ShapeDtypeStruct((grid_b * nc * 8, 128), jnp.float32),
        grid_spec=pltpu.PrefetchScalarGridSpec(
            num_scalar_prefetch=0,
            grid=(grid_b, nc, grid_dc),
            in_specs=[
                pl.BlockSpec((TB, TD), in_map),
                pl.BlockSpec((TB, TD), in_map),
            ],
            out_specs=pl.BlockSpec((8, 128), lambda i, j, k: (i * nc + j, 0)),
            scratch_shapes=[pltpu.VMEM((TB, TD), jnp.float32)],
        ),
        compiler_params=pltpu.CompilerParams(
            dimension_semantics=("parallel", "parallel", "arbitrary"),
        ),
    )(x, t)

    # Tiny final reduction of the per-(tile, core) partial sums + mean over batch.
    return jnp.sum(out) / B


def _reference(inp, tgt, weight=1.0):
    B = inp.shape[0]
    x = (inp.reshape(B, -1) - tgt.reshape(B, -1)).astype(jnp.float32) * weight
    ax = jnp.abs(x)
    v = jnp.where(ax < 1.0, 0.5 * x * x, ax - 0.5)
    return jnp.mean(jnp.sum(v, axis=-1))


if __name__ == "__main__":
    key = jax.random.PRNGKey(0)

    # Case 1: the toy NCHW shape from the module spec (single tile, grid 1x1x1).
    k1, k2 = jax.random.split(key)
    x = jax.random.normal(k1, (2, 4, 16, 16), dtype=jnp.float32) * 2.0
    y = jax.random.normal(k2, (2, 4, 16, 16), dtype=jnp.float32) * 2.0
    out = jax.block_until_ready(smooth_l1_loss(x, y, weight=1.0))
    ref = jax.block_until_ready(_reference(x, y, weight=1.0))
    assert jnp.allclose(out, ref, rtol=1e-5, atol=1e-5), (out, ref)

    # Case 2: exercises feature tiling, the 2-way core split, and column masking
    # (D = 1600 is not a multiple of the 1024-wide tile).
    k3, k4 = jax.random.split(k1)
    x2 = jax.random.normal(k3, (10, 4, 20, 20), dtype=jnp.float32) * 2.0
    y2 = jax.random.normal(k4, (10, 4, 20, 20), dtype=jnp.float32) * 2.0
    out2 = jax.block_until_ready(smooth_l1_loss(x2, y2, weight=0.5))
    ref2 = jax.block_until_ready(_reference(x2, y2, weight=0.5))
    assert jnp.allclose(out2, ref2, rtol=1e-5, atol=1e-5), (out2, ref2)

    # Case 3: small tile caps to exercise batch tiling + row masking paths.
    out3 = jax.block_until_ready(
        smooth_l1_loss(x2, y2, weight=1.0, tb_cap=8, td_cap=512))
    ref3 = jax.block_until_ready(_reference(x2, y2, weight=1.0))
    assert jnp.allclose(out3, ref3, rtol=1e-5, atol=1e-5), (out3, ref3)

    print("KERNEL_OK")
</pallas_src>

<mosaic_0001>
module attributes {stable_mosaic.version = 11 : i64} {
  func.func @_smooth_l1_kernel(%arg0: i32, %arg1: i32, %arg2: i32, %arg3: memref<2x1024xf32, #tpu.memory_space<vmem>>, %arg4: memref<2x1024xf32, #tpu.memory_space<vmem>>, %arg5: memref<8x128xf32, #tpu.memory_space<vmem>>, %arg6: memref<2x1024xf32, #tpu.memory_space<vmem>>) attributes {dimension_semantics = [#tpu.dimension_semantics<parallel>, #tpu.dimension_semantics<parallel>, #tpu.dimension_semantics<arbitrary>], iteration_bounds = array<i64: 1, 1, 1>, scalar_prefetch = 0 : i64, scratch_operands = 1 : i64, tpu.core_type = #tpu.core_type<tc>, window_params = [{transform_indices = @transform_0, window_bounds = array<i64: 2, 1024>}, {transform_indices = @transform_1, window_bounds = array<i64: 2, 1024>}, {transform_indices = @transform_2, window_bounds = array<i64: 8, 128>}]} {
    %c0_i32 = arith.constant 0 : i32
    %0 = arith.cmpi eq, %arg2, %c0_i32 : i32
    %1 = arith.extui %0 : i1 to i32
    %c0_i32_0 = arith.constant 0 : i32
    %2 = arith.cmpi ne, %1, %c0_i32_0 : i32
    scf.if %2 {
      %cst_13 = arith.constant 0.000000e+00 : f32
      %23 = vector.broadcast %cst_13 : f32 to vector<2x1024xf32>
      %c0_14 = arith.constant 0 : index
      %c0_15 = arith.constant 0 : index
      %24 = vector.load %arg6[%c0_14, %c0_15] : memref<2x1024xf32, #tpu.memory_space<vmem>>, vector<2x1024xf32>
      tpu.vector_store %arg6[%c0_14, %c0_15], %23 {strides = array<i32>} : memref<2x1024xf32, #tpu.memory_space<vmem>>, vector<2x1024xf32>,
    } else {
    }
    %c0 = arith.constant 0 : index
    %c0_1 = arith.constant 0 : index
    %3 = vector.load %arg3[%c0, %c0_1] : memref<2x1024xf32, #tpu.memory_space<vmem>>, vector<2x1024xf32>
    %c0_2 = arith.constant 0 : index
    %c0_3 = arith.constant 0 : index
    %4 = vector.load %arg4[%c0_2, %c0_3] : memref<2x1024xf32, #tpu.memory_space<vmem>>, vector<2x1024xf32>
    %5 = arith.subf %3, %4 : vector<2x1024xf32>
    %cst = arith.constant 1.000000e+00 : f32
    %6 = vector.broadcast %cst : f32 to vector<2x1024xf32>
    %7 = arith.mulf %5, %6 : vector<2x1024xf32>
    %8 = math.absf %7 : vector<2x1024xf32>
    %cst_4 = arith.constant 1.000000e+00 : f32
    %9 = vector.broadcast %cst_4 : f32 to vector<2x1024xf32>
    %10 = arith.cmpf olt, %8, %9 : vector<2x1024xf32>
    %cst_5 = arith.constant 5.000000e-01 : f32
    %11 = vector.broadcast %cst_5 : f32 to vector<2x1024xf32>
    %12 = arith.mulf %11, %7 : vector<2x1024xf32>
    %13 = arith.mulf %12, %7 : vector<2x1024xf32>
    %cst_6 = arith.constant 5.000000e-01 : f32
    %14 = vector.broadcast %cst_6 : f32 to vector<2x1024xf32>
    %15 = arith.subf %8, %14 : vector<2x1024xf32>
    %16 = arith.select %10, %13, %15 : vector<2x1024xi1>, vector<2x1024xf32>
    %c0_7 = arith.constant 0 : index
    %c0_8 = arith.constant 0 : index
    %17 = vector.load %arg6[%c0_7, %c0_8] : memref<2x1024xf32, #tpu.memory_space<vmem>>, vector<2x1024xf32>
    %18 = arith.addf %17, %16 : vector<2x1024xf32>
    %c0_9 = arith.constant 0 : index
    %c0_10 = arith.constant 0 : index
    %19 = vector.load %arg6[%c0_9, %c0_10] : memref<2x1024xf32, #tpu.memory_space<vmem>>, vector<2x1024xf32>
    tpu.vector_store %arg6[%c0_9, %c0_10], %18 {strides = array<i32>} : memref<2x1024xf32, #tpu.memory_space<vmem>>, vector<2x1024xf32>,
    %c0_i32_11 = arith.constant 0 : i32
    %20 = arith.cmpi eq, %arg2, %c0_i32_11 : i32
    %21 = arith.extui %20 : i1 to i32
    %c0_i32_12 = arith.constant 0 : i32
    %22 = arith.cmpi ne, %21, %c0_i32_12 : i32
    scf.if %22 {
      %c0_13 = arith.constant 0 : index
      %c0_14 = arith.constant 0 : index
      %23 = vector.load %arg6[%c0_13, %c0_14] : memref<2x1024xf32, #tpu.memory_space<vmem>>, vector<2x1024xf32>
      %24 = vector.shape_cast %23 : vector<2x1024xf32> to vector<1x2x1024xf32>
      %cst_15 = arith.constant dense<0.000000e+00> : vector<1xf32>
      %25 = vector.multi_reduction <add>, %24, %cst_15 [1, 2] : vector<1x2x1024xf32> to vector<1xf32>
      %26 = vector.shape_cast %25 : vector<1xf32> to vector<1x1x1xf32>
      %27 = vector.extract %26[0, 0, 0] : f32 from vector<1x1x1xf32>
      %28 = tpu.iota {dimensions = array<i32: 0>} : vector<8x128xi32>
      %29 = tpu.iota {dimensions = array<i32: 1>} : vector<8x128xi32>
      %c0_i32_16 = arith.constant 0 : i32
      %30 = vector.broadcast %c0_i32_16 : i32 to vector<8x128xi32>
      %31 = arith.cmpi eq, %28, %30 : vector<8x128xi32>
      %c0_i32_17 = arith.constant 0 : i32
      %32 = vector.broadcast %c0_i32_17 : i32 to vector<8x128xi32>
      %33 = arith.cmpi eq, %29, %32 : vector<8x128xi32>
      %34 = arith.andi %31, %33 : vector<8x128xi1>
      %cst_18 = arith.constant 0.000000e+00 : f32
      %35 = vector.broadcast %27 : f32 to vector<8x128xf32>
      %36 = vector.broadcast %cst_18 : f32 to vector<8x128xf32>
      %37 = arith.select %34, %35, %36 : vector<8x128xi1>, vector<8x128xf32>
      %c0_19 = arith.constant 0 : index
      %c0_20 = arith.constant 0 : index
      %38 = vector.load %arg5[%c0_19, %c0_20] : memref<8x128xf32, #tpu.memory_space<vmem>>, vector<8x128xf32>
      tpu.vector_store %arg5[%c0_19, %c0_20], %37 {strides = array<i32>} : memref<8x128xf32, #tpu.memory_space<vmem>>, vector<8x128xf32>,
    } else {
    }
    return
  }
  func.func @transform_0(%arg0: i32, %arg1: i32, %arg2: i32) -> (i32, i32) {
    %c1_i32 = arith.constant 1 : i32
    %0 = arith.muli %arg1, %c1_i32 : i32
    %1 = arith.addi %0, %arg2 : i32
    %c0_i32 = arith.constant 0 : i32
    %2 = arith.minsi %1, %c0_i32 : i32
    %c0_i32_0 = arith.constant 0 : i32
    return %arg0, %2 : i32, i32
  }
  func.func @transform_1(%arg0: i32, %arg1: i32, %arg2: i32) -> (i32, i32) {
    %c1_i32 = arith.constant 1 : i32
    %0 = arith.muli %arg1, %c1_i32 : i32
    %1 = arith.addi %0, %arg2 : i32
    %c0_i32 = arith.constant 0 : i32
    %2 = arith.minsi %1, %c0_i32 : i32
    %c0_i32_0 = arith.constant 0 : i32
    return %arg0, %2 : i32, i32
  }
  func.func @transform_2(%arg0: i32, %arg1: i32, %arg2: i32) -> (i32, i32) {
    %c1_i32 = arith.constant 1 : i32
    %0 = arith.muli %arg0, %c1_i32 : i32
    %1 = arith.addi %0, %arg1 : i32
    %c0_i32 = arith.constant 0 : i32
    %c0_i32_0 = arith.constant 0 : i32
    return %1, %c0_i32 : i32, i32
  }
}

</mosaic_0001>

<bundles_post_ra>
// kernel: tpu_custom_call.1
= control target key start
LH: loop header
LB: loop body
LE: loop exit
PB: predicated region body
PF: predicated region fallthrough
CT: control target
= control target key end

     0   :  { %7 = vsyncpa [#allocation4], 0  ;;  %s337_s0 = inlined_call_operand.hbm [shape: f32[2,1024], index: 0, kind: input, shape index: {}]   ;;  %s338_s1 = inlined_call_operand.hbm [shape: f32[2,1024], index: 1, kind: input, shape index: {}]   ;;  %s339_s2 = inlined_call_operand.hbm [shape: f32[8,128], index: 2, kind: output, shape index: {}]  }
   0x1   :  { %8 = vsyncpa [#allocation7], 0 }
   0x2   :  { %9 = vsyncpa [#allocation5], 0  ;;  %s274_s9 = smov [#allocation3]   ;;  %s275_s11 = smov [#allocation6]  }
   0x3   :  { %s22_s10 = sshll.u32 %s274_s9, 4  ;;  %s38_s12 = sshll.u32 %s275_s11, 4  ;;  %s23_s10 = int_to_ptr.vmem [resolvable:$true] %s22_s10  ;;  %s39_s12 = int_to_ptr.vmem [resolvable:$true] %s38_s12 }
   0x4   :  { %s202_s15 = scalar_lea.hbm %s337_s0, 256 }
   0x5   :  { %p203_p0 = scmp.ne.s32.totalorder %s337_s0, %s202_s15  ;;  %p206_p1 = scmp.lt.u32.totalorder %s202_s15, %s337_s0 }
   0x7   :  { %p208_p2 = pnand %p206_p1, %p203_p0 }
   0x9   :  { %211 = shalt.err (!%p208_p2)
}
   0xa   :  { %s212_s20 = scalar_lea.vmem %s23_s10, 256  ;;  %p217_p4 = scmp.lt.s32.totalorder %s23_s10, %s23_s10 }
   0xb   :  { %p213_p3 = scmp.ne.s32.totalorder %s23_s10, %s212_s20  ;;  %p218_p5 = scmp.lt.s32.totalorder %s212_s20, %s212_s20 }
   0xd   :  { %p219_p6 = por %p218_p5, %p217_p4 }
   0xf   :  { %p220_p7 = pnand %p219_p6, %p213_p3 }
  0x11   :  { %223 = shalt.err (!%p220_p7)
}
  0x12   :  { %25 = dma.hbm_to_vmem [thread:$0]  %s337_s0, 256, %s23_s10, [#allocation4]  }
  0x13   :  { %s224_s25 = scalar_lea.hbm %s338_s1, 256 }
  0x14   :  { %p225_p8 = scmp.ne.s32.totalorder %s338_s1, %s224_s25  ;;  %p228_p9 = scmp.lt.u32.totalorder %s224_s25, %s338_s1 }
  0x16   :  { %p230_p10 = pnand %p228_p9, %p225_p8 }
  0x18   :  { %233 = shalt.err (!%p230_p10)
}
  0x19   :  { %s234_s30 = scalar_lea.vmem %s39_s12, 256  ;;  %p239_p12 = scmp.lt.s32.totalorder %s39_s12, %s39_s12 }
  0x1a   :  { %p235_p11 = scmp.ne.s32.totalorder %s39_s12, %s234_s30  ;;  %p240_p13 = scmp.lt.s32.totalorder %s234_s30, %s234_s30 }
  0x1c   :  { %p241_p0 = por %p240_p13, %p239_p12 }
  0x1e   :  { %p242_p1 = pnand %p241_p0, %p235_p11 }
  0x20   :  { %245 = shalt.err (!%p242_p1)
}
  0x21   :  { %41 = dma.hbm_to_vmem [thread:$0]  %s338_s1, 256, %s39_s12, [#allocation7]  }
  0x22   :  { %268 = dma.done.wait [#allocation4], 256  }
  0x23   :  { %269 = vsyncadd [#allocation4], 4294967040 }
  0x24   :  { %270 = dma.done.wait [#allocation7], 256  }
  0x25   :  { %271 = vsyncadd [#allocation7], 4294967040  ;;  %v276_v0 = vmov 1983009808   ;;  %v98_v2 = vlaneseq  ;;  %v63_v3 = vld [vmem:[#allocation3] sm:$0xff]  ;;  %v64_v4 = vld [vmem:[#allocation3 + $0x8] sm:$0xff] }
  0x26   :  { %v96_v1 = vunpack.c.l.s4 %v276_v0  ;;  %v65_v5 = vld [vmem:[#allocation6] sm:$0xff]  ;;  %v66_v8 = vld [vmem:[#allocation6 + $0x8] sm:$0xff]  ;;  %vm136_vm2 = vcmask 1041408   ;;  %s277_s1 = smov [#allocation8]  }
  0x27   :  { %v99_v7 = vshrl.u32 %v98_v2, 7  ;;  %v67_v9 = vsub.f32 %v63_v3, %v65_v5  ;;  %v68_v10 = vsub.f32 %v64_v4, %v66_v8  ;;  %v164_v54 = vand.u32 127, %v98_v2  ;;  %s180_s4 = sshll.u32 %s277_s1, 4  ;;  %s181_s4 = int_to_ptr.vmem [resolvable:$true] %s180_s4 }
  0x28   :  { %v97_v6 = vunpack.c.0.s8 %v96_v1  ;;  %s246_s6 = scalar_lea.vmem %s181_s4, 128  ;;  %p251_p3 = scmp.lt.s32.totalorder %s181_s4, %s181_s4 }
  0x29   :  { %v69_v11 = vand.u32 2147483647, %v67_v9  ;;  %v73_v12 = vmul.f32 0.5, %v67_v9  ;;  %v70_v13 = vand.u32 2147483647, %v68_v10  ;;  %v74_v14 = vmul.f32 0.5, %v68_v10  ;;  %p247_p2 = scmp.ne.s32.totalorder %s181_s4, %s246_s6  ;;  %p252_p4 = scmp.lt.s32.totalorder %s246_s6, %s246_s6 }
  0x2a   :  { %v100_v15 = vsub.s32 %v97_v6, %v99_v7  ;;  %vm165_vm3 = vcmp.eq.s32.totalorder %v99_v7, 0  ;;  %vm166_vm4 = vcmp.eq.s32.totalorder %v164_v54, 0 }
  0x2b   :  { %vm71_vm0 = vcmp.lt.f32.partialorder %v69_v11, 1.0  ;;  %v75_v16 = vmul.f32 %v73_v12, %v67_v9  ;;  %v194_v17 = vadd.f32 -0.5, %v69_v11  ;;  %vm72_vm1 = vcmp.lt.f32.partialorder %v70_v13, 1.0  ;;  %vm167_vm5 = vmand %vm165_vm3, %vm166_vm4  ;;  %p253_p5 = por %p252_p4, %p251_p3 }
  0x2c   :  { %v76_v18 = vmul.f32 %v74_v14, %v68_v10  ;;  %v195_v19 = vadd.f32 -0.5, %v70_v13 }
  0x2d   :  { %v79_v20 = vsel %vm71_vm0, %v75_v16, %v194_v17  ;;  %p254_p6 = pnand %p253_p5, %p247_p2 }
  0x2e   :  { %v80_v21 = vsel %vm72_vm1, %v76_v18, %v195_v19  ;;  %v94_v22 = vcombine.high %v79_v20, %v79_v20  ;;  %v101_v23 = vrot.slane %v79_v20, %v100_v15 }
  0x2f   :  { %v111_v24 = vcombine.high %v80_v21, %v80_v21  ;;  %v118_v27 = vrot.slane %v80_v21, %v100_v15 }
  0x30   :  { %v108_v25 = vrot.slane %v94_v22, %v100_v15  ;;  %v109_v26 = vcombine.high %v101_v23, %v101_v23  ;;  %v137_v28 = vsel %vm136_vm2, %v101_v23, 0.0 }
  0x31   :  { %v125_v33 = vrot.slane %v111_v24, %v100_v15  ;;  %v126_v34 = vcombine.high %v118_v27, %v118_v27  ;;  %v144_v37 = vsel %vm136_vm2, %v118_v27, 0.0 }
  0x32   :  { %v110_v29 = vcombine.high %v108_v25, %v108_v25  ;;  %v138_v30 = vsel %vm136_vm2, %v109_v26, 0.0  ;;  %v140_v31 = vsel %vm136_vm2, %v108_v25, 0.0 }
  0x33   :  { %v139_v32 = vadd.f32 %v138_v30, %v137_v28  ;;  %v127_v39 = vcombine.high %v125_v33, %v125_v33  ;;  %v146_v40 = vsel %vm136_vm2, %v126_v34, 0.0  ;;  %v148_v42 = vsel %vm136_vm2, %v125_v33, 0.0 }
  0x34   :  { %v142_v35 = vsel %vm136_vm2, %v110_v29, 0.0 }
  0x35   :  { %v141_v36 = vadd.f32 %v140_v31, %v139_v32  ;;  %v150_v44 = vsel %vm136_vm2, %v127_v39, 0.0 }
  0x37   :  { %v143_v38 = vadd.f32 %v142_v35, %v141_v36 }
  0x39   :  { %v145_v41 = vadd.f32 %v144_v37, %v143_v38 }
  0x3b   :  { %v147_v43 = vadd.f32 %v146_v40, %v145_v41 }
  0x3d   :  { %v149_v45 = vadd.f32 %v148_v42, %v147_v43 }
  0x3f   :  { %v151_v46 = vadd.f32 %v150_v44, %v149_v45 }
  0x41   :  { %152 = vadd.xlane.f32.xlu0 %v151_v46 }
  0xce   :  { %v153_v47 = vpop.xlane.xlu0 %152 }
  0xcf   :  { %v154_v48 = vrot.slane %v153_v47, 4 }
  0xd1   :  { %v155_v49 = vadd.f32 %v154_v48, %v153_v47 }
  0xd3   :  { %v156_v50 = vrot.slane %v155_v49, 2 }
  0xd5   :  { %v157_v51 = vadd.f32 %v156_v50, %v155_v49 }
  0xd7   :  { %v158_v52 = vrot.slane %v157_v51, 1 }
  0xd9   :  { %v159_v53 = vadd.f32 %v158_v52, %v157_v51 }
  0xdb   :  { %196 = vpush %v159_v53 }
 0x10c   :  { %s197_s5 = spop %196 }
 0x10d   :  { %v168_v55 = vstv %s197_s5 }
 0x10e   :  { %v169_v56 = vsel %vm167_vm5, %v168_v55, 0.0 }
 0x10f   :  { %170 = vst [vmem:[#allocation8] sm:$0xff] %v169_v56 }
 0x110   :  { %257 = shalt.err (!%p254_p6)
}
 0x111   :  { %s258_s9 = scalar_lea.hbm %s339_s2, 128 }
 0x112   :  { %p259_p7 = scmp.ne.s32.totalorder %s339_s2, %s258_s9  ;;  %p262_p8 = scmp.lt.u32.totalorder %s258_s9, %s339_s2 }
 0x114   :  { %p264_p9 = pnand %p262_p8, %p259_p7 }
 0x116   :  { %267 = shalt.err (!%p264_p9)
}
 0x117   :  { %183 = dma.vmem_to_hbm [thread:$0]  %s181_s4, 128, %s339_s2, [#allocation5]  }
 0x118   :  { %272 = dma.done.wait [#allocation5], 128  }
 0x119   :  { %273 = vsyncadd [#allocation5], 4294967168 }
 0x11a   :  { %187 = vsyncpa [#allocation4], 1 }
 0x11b   :  { %188 = vsyncpa [#allocation7], 1 }
 0x11c   :  { %189 = vsyncpa [#allocation5], 1 }

</bundles_post_ra>
